<compile_context>
chip_gen: v6e
topology: v6e:2x2x1
jax: 0.10.0
libtpu: 0.0.40
codegen_flags: <defaults>
</compile_context>

<pallas_src>
import functools

import jax
import jax.numpy as jnp
from jax import lax
from jax.experimental import pallas as pl
from jax.experimental.pallas import tpu as pltpu


# --------------------------------------------------------------------------
# VMEM sizing helpers
# --------------------------------------------------------------------------
def _vmem_capacity_bytes():
    try:
        return int(pltpu.get_tpu_info().vmem_capacity_bytes)
    except Exception:
        return 64 * 1024 * 1024  # conservative fallback (v7x per-core VMEM)


def _vmem_limit(need_bytes, cap):
    # Explicit scoped-VMEM limit: what we need plus headroom, capped below
    # the physical capacity.
    return int(min(int(0.9 * cap), max(need_bytes + (4 << 20), 32 << 20)))


def _choose_block_t(C, T, itemsize, cap):
    # Size the T tile by bytes, not by a fixed lane cap: the largest
    # lane-dense (multiple-of-128) block whose pass-2 working set
    # (2x double-buffered input + 2x output + one f32 upcast temp)
    # stays within ~cap/3.  Large tiles keep us HBM-bound instead of
    # per-grid-step-overhead bound (overhead ~0.35 us/step) and make each
    # strided DMA row long and contiguous.
    budget = max(8 << 20, cap // 3)
    per_lane = C * (4 * itemsize + 4)
    t_blk = (budget // per_lane) // 128 * 128
    t_blk = int(max(128, t_blk))
    if t_blk >= T:
        return T  # full-T block is always a legal block shape
    return t_blk


def _spec(shape, index_map, buffers=None):
    # BlockSpec helper; optionally requests explicit buffer depth
    # (pl.Buffered(1) => single-buffered full-slab specs on the fused path).
    if buffers is not None and hasattr(pl, "Buffered"):
        try:
            return pl.BlockSpec(shape, index_map,
                                pipeline_mode=pl.Buffered(buffers))
        except TypeError:  # older BlockSpec without pipeline_mode kwarg
            pass
    return pl.BlockSpec(shape, index_map)


# --------------------------------------------------------------------------
# Fused path: one batch element's full (C, T) slab per grid step.
# Stats + normalize are evaluated in T-chunks so f32 temporaries stay small.
# --------------------------------------------------------------------------
def _gln_fused_kernel(x_ref, gamma_ref, beta_ref, o_ref, *, eps, inv_n, chunk_t):
    C, T = x_ref.shape

    # ---- stats sweep: per-channel sum / sum-of-squares in f32 -------------
    if T <= chunk_t:
        xf = x_ref[...].astype(jnp.float32)               # (C, T)
        row_s = jnp.sum(xf, axis=1, keepdims=True)        # (C, 1)
        row_ss = jnp.sum(xf * xf, axis=1, keepdims=True)  # (C, 1)
    else:
        n_full = T // chunk_t
        rem = T - n_full * chunk_t

        def body(i, carry):
            rs, rss = carry
            start = pl.multiple_of(i * chunk_t, 128)
            xc = x_ref[:, pl.ds(start, chunk_t)].astype(jnp.float32)
            rs = rs + jnp.sum(xc, axis=1, keepdims=True)
            rss = rss + jnp.sum(xc * xc, axis=1, keepdims=True)
            return rs, rss

        zeros = jnp.zeros((C, 1), jnp.float32)
        row_s, row_ss = lax.fori_loop(0, n_full, body, (zeros, zeros),
                                      unroll=(n_full <= 8))
        if rem:
            xr = x_ref[:, pl.ds(n_full * chunk_t, rem)].astype(jnp.float32)
            row_s = row_s + jnp.sum(xr, axis=1, keepdims=True)
            row_ss = row_ss + jnp.sum(xr * xr, axis=1, keepdims=True)

    s = jnp.sum(row_s)
    ss = jnp.sum(row_ss)
    mean = s * inv_n
    var = jnp.maximum(ss * inv_n - mean * mean, 0.0)
    rstd = lax.rsqrt(var + eps)
    # Folded per-channel affine: y = x*scale + shift (2 VPU ops / element).
    scale = gamma_ref[...].astype(jnp.float32) * rstd     # (C, 1)
    shift = beta_ref[...].astype(jnp.float32) - mean * scale

    # ---- normalize sweep (VMEM-resident x, chunked f32 temps) -------------
    if T <= chunk_t:
        o_ref[...] = (x_ref[...].astype(jnp.float32) * scale
                      + shift).astype(o_ref.dtype)
    else:
        n_full = T // chunk_t
        rem = T - n_full * chunk_t

        def nbody(i, carry):
            start = pl.multiple_of(i * chunk_t, 128)
            xc = x_ref[:, pl.ds(start, chunk_t)].astype(jnp.float32)
            o_ref[:, pl.ds(start, chunk_t)] = (xc * scale
                                               + shift).astype(o_ref.dtype)
            return carry

        lax.fori_loop(0, n_full, nbody, 0, unroll=(n_full <= 8))
        if rem:
            xr = x_ref[:, pl.ds(n_full * chunk_t, rem)].astype(jnp.float32)
            o_ref[:, pl.ds(n_full * chunk_t, rem)] = (
                xr * scale + shift).astype(o_ref.dtype)


def _gln_fused(x, gamma, beta, eps, need_bytes, cap, *, buffers, chunk_t):
    N, C, T = x.shape
    kernel = functools.partial(_gln_fused_kernel, eps=float(eps),
                               inv_n=1.0 / (C * T), chunk_t=int(chunk_t))
    return pl.pallas_call(
        kernel,
        out_shape=jax.ShapeDtypeStruct((N, C, T), x.dtype),
        grid=(N,),
        in_specs=[
            _spec((None, C, T), lambda n: (n, 0, 0), buffers),
            pl.BlockSpec((C, 1), lambda n: (0, 0)),
            pl.BlockSpec((C, 1), lambda n: (0, 0)),
        ],
        out_specs=_spec((None, C, T), lambda n: (n, 0, 0), buffers),
        compiler_params=pltpu.CompilerParams(
            dimension_semantics=("parallel",),
            vmem_limit_bytes=_vmem_limit(need_bytes, cap),
        ),
    )(x, gamma, beta)


# --------------------------------------------------------------------------
# Tiled path: pass 1 (stats -> folded scale/shift) + pass 2 (normalize)
# --------------------------------------------------------------------------
def _gln_stats_kernel(x_ref, gamma_ref, beta_ref, scale_ref, shift_ref,
                      csum_ref, csq_ref, *, eps, n_elem, block_t, t_total,
                      needs_mask):
    ti = pl.program_id(1)
    last = pl.num_programs(1) - 1

    @pl.when(ti == 0)
    def _init():
        csum_ref[...] = jnp.zeros_like(csum_ref)
        csq_ref[...] = jnp.zeros_like(csq_ref)

    def accumulate(xf):
        # Per-channel partials kept in VMEM scratch; collapsed once at the end
        # (avoids a cross-sublane reduce + scalar RMW on every tile).
        csum_ref[...] += jnp.sum(xf, axis=1, keepdims=True)
        csq_ref[...] += jnp.sum(xf * xf, axis=1, keepdims=True)

    if needs_mask:
        # Mask the padded lanes only on the last (partial) tile; full tiles
        # take the cheap branch.
        @pl.when(ti != last)
        def _full():
            accumulate(x_ref[...].astype(jnp.float32))

        @pl.when(ti == last)
        def _partial():
            xf = x_ref[...].astype(jnp.float32)
            col = ti * block_t + lax.broadcasted_iota(jnp.int32, xf.shape, 1)
            accumulate(jnp.where(col < t_total, xf, 0.0))
    else:
        accumulate(x_ref[...].astype(jnp.float32))

    @pl.when(ti == last)
    def _finalize():
        inv_n = jnp.float32(1.0 / n_elem)
        s = jnp.sum(csum_ref[...])
        ss = jnp.sum(csq_ref[...])
        m = s * inv_n
        var = jnp.maximum(ss * inv_n - m * m, 0.0)
        rstd = lax.rsqrt(var + eps)
        scale = gamma_ref[...].astype(jnp.float32) * rstd     # (C, 1)
        scale_ref[...] = scale
        shift_ref[...] = beta_ref[...].astype(jnp.float32) - m * scale


def _gln_norm_kernel(x_ref, scale_ref, shift_ref, o_ref):
    scale = scale_ref[...]                                     # (C, 1) f32
    shift = shift_ref[...]                                     # (C, 1) f32
    o_ref[...] = (x_ref[...].astype(jnp.float32) * scale
                  + shift).astype(o_ref.dtype)


def _gln_tiled(x, gamma, beta, eps, block_t, cap):
    N, C, T = x.shape
    itemsize = x.dtype.itemsize
    if block_t is None:
        block_t = _choose_block_t(C, T, itemsize, cap)
    block_t = int(min(block_t, T))
    nt = pl.cdiv(T, block_t)
    needs_mask = (T % block_t) != 0

    # ---- pass 1: sum / sum-of-squares across T tiles -> folded scale/shift
    stats_kernel = functools.partial(
        _gln_stats_kernel, eps=float(eps), n_elem=C * T,
        block_t=block_t, t_total=T, needs_mask=needs_mask)
    stats_need = C * block_t * (2 * itemsize + 4) + 2 * C * 4
    scale, shift = pl.pallas_call(
        stats_kernel,
        out_shape=(jax.ShapeDtypeStruct((N, C, 1), jnp.float32),
                   jax.ShapeDtypeStruct((N, C, 1), jnp.float32)),
        grid=(N, nt),
        in_specs=[
            pl.BlockSpec((None, C, block_t), lambda n, t: (n, 0, t)),
            pl.BlockSpec((C, 1), lambda n, t: (0, 0)),
            pl.BlockSpec((C, 1), lambda n, t: (0, 0)),
        ],
        out_specs=(pl.BlockSpec((None, C, 1), lambda n, t: (n, 0, 0)),
                   pl.BlockSpec((None, C, 1), lambda n, t: (n, 0, 0))),
        scratch_shapes=[pltpu.VMEM((C, 1), jnp.float32),
                        pltpu.VMEM((C, 1), jnp.float32)],
        compiler_params=pltpu.CompilerParams(
            dimension_semantics=("parallel", "arbitrary"),
            vmem_limit_bytes=_vmem_limit(stats_need, cap),
        ),
    )(x, gamma, beta)

    # ---- pass 2: y = x * scale + shift (3 inputs only) --------------------
    norm_need = C * block_t * (4 * itemsize + 4) + 4 * C * 4
    out = pl.pallas_call(
        _gln_norm_kernel,
        out_shape=jax.ShapeDtypeStruct((N, C, T), x.dtype),
        grid=(N, nt),
        in_specs=[
            pl.BlockSpec((None, C, block_t), lambda n, t: (n, 0, t)),
            pl.BlockSpec((None, C, 1), lambda n, t: (n, 0, 0)),
            pl.BlockSpec((None, C, 1), lambda n, t: (n, 0, 0)),
        ],
        out_specs=pl.BlockSpec((None, C, block_t), lambda n, t: (n, 0, t)),
        compiler_params=pltpu.CompilerParams(
            dimension_semantics=("parallel", "parallel"),
            vmem_limit_bytes=_vmem_limit(norm_need, cap),
        ),
    )(x, scale, shift)
    return out


# --------------------------------------------------------------------------
# Public wrapper (matches the PyTorch module's forward semantics)
# --------------------------------------------------------------------------
def global_channel_layer_norm(x, gamma=None, beta=None, eps=1e-5, *,
                              block_t=None, force_tiled=False, chunk_t=512):
    """x: (N, C, T); gamma/beta: (C, 1) or None (elementwise_affine=False)."""
    if x.ndim != 3:
        raise RuntimeError("GlobalChannelLayerNorm accepts 3D tensor as input")
    N, C, T = x.shape
    if gamma is None:
        gamma = jnp.ones((C, 1), dtype=x.dtype)
    if beta is None:
        beta = jnp.zeros((C, 1), dtype=x.dtype)
    gamma = gamma.reshape(C, 1)
    beta = beta.reshape(C, 1)

    cap = _vmem_capacity_bytes()
    itemsize = x.dtype.itemsize
    slab = C * T * itemsize
    # Chunked in-kernel temps: ~2 f32 chunk-sized temporaries live at once.
    temps = C * min(T, chunk_t) * 4 * 2
    fused_need_db = 4 * slab + temps     # double-buffered in + out
    fused_need_sb = 2 * slab + temps     # single-buffered (pl.Buffered(1))
    budget = int(0.7 * cap)

    if not force_tiled:
        if fused_need_db <= budget:
            return _gln_fused(x, gamma, beta, eps, fused_need_db, cap,
                              buffers=None, chunk_t=chunk_t)
        if hasattr(pl, "Buffered") and fused_need_sb <= budget:
            return _gln_fused(x, gamma, beta, eps, fused_need_sb, cap,
                              buffers=1, chunk_t=chunk_t)
    return _gln_tiled(x, gamma, beta, eps, block_t, cap)


def _reference(x, gamma, beta, eps=1e-5):
    mean = jnp.mean(x, axis=(1, 2), keepdims=True)
    var = jnp.mean((x - mean) ** 2, axis=(1, 2), keepdims=True)
    return gamma[None] * (x - mean) / jnp.sqrt(var + eps) + beta[None]


if __name__ == "__main__":
    key = jax.random.PRNGKey(0)

    # --- small shape consistent with the module (N x C x T): fused path ---
    N, C, T = 2, 4, 16
    x = jax.random.normal(key, (N, C, T), dtype=jnp.float32)
    gamma = jnp.ones((C, 1), dtype=jnp.float32)   # module's default init
    beta = jnp.zeros((C, 1), dtype=jnp.float32)

    out = global_channel_layer_norm(x, gamma, beta, eps=1e-5)
    out = jax.block_until_ready(out)
    ref = _reference(x, gamma, beta, eps=1e-5)
    assert out.shape == (N, C, T)
    assert jnp.allclose(out, ref, atol=1e-5, rtol=1e-5)

    # --- elementwise_affine=False (gamma/beta default) ---------------------
    out_na = jax.block_until_ready(global_channel_layer_norm(x, eps=1e-5))
    assert jnp.allclose(out_na, _reference(x, gamma, beta), atol=1e-5, rtol=1e-5)

    # --- fused path with chunked stats/normalize (T > chunk, with remainder) -
    k1, k2, k3 = jax.random.split(jax.random.PRNGKey(0), 3)
    Nf, Cf, Tf = 2, 8, 1280
    xf = jax.random.normal(k1, (Nf, Cf, Tf), dtype=jnp.float32)
    gf = 1.0 + 0.1 * jax.random.normal(k2, (Cf, 1), dtype=jnp.float32)
    bf = 0.1 * jax.random.normal(k3, (Cf, 1), dtype=jnp.float32)
    outf = jax.block_until_ready(
        global_channel_layer_norm(xf, gf, bf, eps=1e-5, chunk_t=512))
    assert jnp.allclose(outf, _reference(xf, gf, bf), atol=1e-4, rtol=1e-4)

    # --- tiled accumulate-then-normalize path (128-lane tiles) -------------
    N2, C2, T2 = 2, 8, 640
    x2 = jax.random.normal(k1, (N2, C2, T2), dtype=jnp.float32)
    gamma2 = 1.0 + 0.1 * jax.random.normal(k2, (C2, 1), dtype=jnp.float32)
    beta2 = 0.1 * jax.random.normal(k3, (C2, 1), dtype=jnp.float32)
    out2 = jax.block_until_ready(
        global_channel_layer_norm(x2, gamma2, beta2, eps=1e-5,
                                  force_tiled=True, block_t=128))
    assert jnp.allclose(out2, _reference(x2, gamma2, beta2), atol=1e-4, rtol=1e-4)

    # --- tiled path with a partial last tile (T not a multiple of block_t) -
    N3, C3, T3 = 2, 8, 200
    x3 = jax.random.normal(k2, (N3, C3, T3), dtype=jnp.float32)
    gamma3 = jnp.ones((C3, 1), dtype=jnp.float32)
    beta3 = jnp.zeros((C3, 1), dtype=jnp.float32)
    out3 = jax.block_until_ready(
        global_channel_layer_norm(x3, gamma3, beta3, eps=1e-5,
                                  force_tiled=True, block_t=128))
    assert jnp.allclose(out3, _reference(x3, gamma3, beta3), atol=1e-4, rtol=1e-4)

    # --- tiled path with auto block_t sizing (byte-based, full-T tile) -----
    out4 = jax.block_until_ready(
        global_channel_layer_norm(x2, gamma2, beta2, eps=1e-5, force_tiled=True))
    assert jnp.allclose(out4, _reference(x2, gamma2, beta2), atol=1e-4, rtol=1e-4)

    print("KERNEL_OK")
</pallas_src>

<mosaic_0001>
module attributes {stable_mosaic.version = 11 : i64} {
  func.func @_gln_fused_kernel(%arg0: i32, %arg1: memref<1x4x16xf32, #tpu.memory_space<vmem>>, %arg2: memref<4x1xf32, #tpu.memory_space<vmem>>, %arg3: memref<4x1xf32, #tpu.memory_space<vmem>>, %arg4: memref<1x4x16xf32, #tpu.memory_space<vmem>>) attributes {dimension_semantics = [#tpu.dimension_semantics<parallel>], iteration_bounds = array<i64: 2>, scalar_prefetch = 0 : i64, scratch_operands = 0 : i64, tpu.core_type = #tpu.core_type<tc>, window_params = [{transform_indices = @transform_0, window_bounds = array<i64: 1, 4, 16>}, {pipeline_mode = #tpu.pipeline_mode<synchronous>, transform_indices = @transform_1, window_bounds = array<i64: 4, 1>}, {pipeline_mode = #tpu.pipeline_mode<synchronous>, transform_indices = @transform_2, window_bounds = array<i64: 4, 1>}, {transform_indices = @transform_3, window_bounds = array<i64: 1, 4, 16>}]} {
    %c0 = arith.constant 0 : index
    %c0_0 = arith.constant 0 : index
    %c0_1 = arith.constant 0 : index
    %0 = vector.load %arg1[%c0, %c0_0, %c0_1] : memref<1x4x16xf32, #tpu.memory_space<vmem>>, vector<1x4x16xf32>
    %1 = vector.shape_cast %0 : vector<1x4x16xf32> to vector<4x16xf32>
    %cst = arith.constant dense<0.000000e+00> : vector<4xf32>
    %2 = vector.multi_reduction <add>, %1, %cst [1] : vector<4x16xf32> to vector<4xf32>
    %3 = vector.shape_cast %2 : vector<4xf32> to vector<4x1xf32>
    %4 = arith.mulf %1, %1 : vector<4x16xf32>
    %cst_2 = arith.constant dense<0.000000e+00> : vector<4xf32>
    %5 = vector.multi_reduction <add>, %4, %cst_2 [1] : vector<4x16xf32> to vector<4xf32>
    %6 = vector.shape_cast %5 : vector<4xf32> to vector<4x1xf32>
    %7 = vector.shape_cast %3 : vector<4x1xf32> to vector<1x4x1xf32>
    %cst_3 = arith.constant dense<0.000000e+00> : vector<1xf32>
    %8 = vector.multi_reduction <add>, %7, %cst_3 [1, 2] : vector<1x4x1xf32> to vector<1xf32>
    %9 = vector.shape_cast %8 : vector<1xf32> to vector<1x1x1xf32>
    %10 = vector.extract %9[0, 0, 0] : f32 from vector<1x1x1xf32>
    %11 = vector.shape_cast %6 : vector<4x1xf32> to vector<1x4x1xf32>
    %cst_4 = arith.constant dense<0.000000e+00> : vector<1xf32>
    %12 = vector.multi_reduction <add>, %11, %cst_4 [1, 2] : vector<1x4x1xf32> to vector<1xf32>
    %13 = vector.shape_cast %12 : vector<1xf32> to vector<1x1x1xf32>
    %14 = vector.extract %13[0, 0, 0] : f32 from vector<1x1x1xf32>
    %cst_5 = arith.constant 1.562500e-02 : f32
    %15 = arith.mulf %10, %cst_5 : f32
    %cst_6 = arith.constant 1.562500e-02 : f32
    %16 = arith.mulf %14, %cst_6 : f32
    %17 = arith.mulf %15, %15 : f32
    %18 = arith.subf %16, %17 : f32
    %cst_7 = arith.constant 0.000000e+00 : f32
    %19 = arith.maximumf %18, %cst_7 : f32
    %cst_8 = arith.constant 9.99999974E-6 : f32
    %20 = arith.addf %19, %cst_8 : f32
    %21 = math.rsqrt %20 : f32
    %c0_9 = arith.constant 0 : index
    %c0_10 = arith.constant 0 : index
    %22 = vector.load %arg2[%c0_9, %c0_10] : memref<4x1xf32, #tpu.memory_space<vmem>>, vector<4x1xf32>
    %23 = vector.broadcast %21 : f32 to vector<4x1xf32>
    %24 = arith.mulf %22, %23 : vector<4x1xf32>
    %c0_11 = arith.constant 0 : index
    %c0_12 = arith.constant 0 : index
    %25 = vector.load %arg3[%c0_11, %c0_12] : memref<4x1xf32, #tpu.memory_space<vmem>>, vector<4x1xf32>
    %26 = vector.broadcast %15 : f32 to vector<4x1xf32>
    %27 = arith.mulf %26, %24 : vector<4x1xf32>
    %28 = arith.subf %25, %27 : vector<4x1xf32>
    %c0_13 = arith.constant 0 : index
    %c0_14 = arith.constant 0 : index
    %c0_15 = arith.constant 0 : index
    %29 = vector.load %arg1[%c0_13, %c0_14, %c0_15] : memref<1x4x16xf32, #tpu.memory_space<vmem>>, vector<1x4x16xf32>
    %30 = vector.shape_cast %29 : vector<1x4x16xf32> to vector<4x16xf32>
    %31 = vector.broadcast %24 : vector<4x1xf32> to vector<4x16xf32>
    %32 = arith.mulf %30, %31 : vector<4x16xf32>
    %33 = vector.broadcast %28 : vector<4x1xf32> to vector<4x16xf32>
    %34 = arith.addf %32, %33 : vector<4x16xf32>
    %c0_16 = arith.constant 0 : index
    %c0_17 = arith.constant 0 : index
    %c0_18 = arith.constant 0 : index
    %35 = vector.load %arg4[%c0_16, %c0_17, %c0_18] : memref<1x4x16xf32, #tpu.memory_space<vmem>>, vector<1x4x16xf32>
    %36 = vector.shape_cast %35 : vector<1x4x16xf32> to vector<4x16xf32>
    %37 = vector.shape_cast %34 : vector<4x16xf32> to vector<1x4x16xf32>
    tpu.vector_store %arg4[%c0_16, %c0_17, %c0_18], %37 {strides = array<i32>} : memref<1x4x16xf32, #tpu.memory_space<vmem>>, vector<1x4x16xf32>,
    return
  }
  func.func @transform_0(%arg0: i32) -> (i32, i32, i32) {
    %c0_i32 = arith.constant 0 : i32
    %c0_i32_0 = arith.constant 0 : i32
    %c0_i32_1 = arith.constant 0 : i32
    return %arg0, %c0_i32, %c0_i32_0 : i32, i32, i32
  }
  func.func @transform_1(%arg0: i32) -> (i32, i32) {
    %c0_i32 = arith.constant 0 : i32
    %c0_i32_0 = arith.constant 0 : i32
    %c0_i32_1 = arith.constant 0 : i32
    return %c0_i32, %c0_i32_0 : i32, i32
  }
  func.func @transform_2(%arg0: i32) -> (i32, i32) {
    %c0_i32 = arith.constant 0 : i32
    %c0_i32_0 = arith.constant 0 : i32
    %c0_i32_1 = arith.constant 0 : i32
    return %c0_i32, %c0_i32_0 : i32, i32
  }
  func.func @transform_3(%arg0: i32) -> (i32, i32, i32) {
    %c0_i32 = arith.constant 0 : i32
    %c0_i32_0 = arith.constant 0 : i32
    %c0_i32_1 = arith.constant 0 : i32
    return %arg0, %c0_i32, %c0_i32_0 : i32, i32, i32
  }
}

</mosaic_0001>

<bundles_post_ra>
// kernel: tpu_custom_call.1
= control target key start
LH: loop header
LB: loop body
LE: loop exit
PB: predicated region body
PF: predicated region fallthrough
CT: control target
= control target key end

     0   :  { %8 = vsyncpa [#allocation3], 0  ;;  %s540_s0 = inlined_call_operand.vmem [shape: f32[2,4,16], index: 0, kind: input, shape index: {}]   ;;  %s541_s1 = inlined_call_operand.vmem [shape: f32[4,1], index: 1, kind: input, shape index: {}]   ;;  %s542_s2 = inlined_call_operand.vmem [shape: f32[4,1], index: 2, kind: input, shape index: {}]   ;;  %s543_s3 = inlined_call_operand.hbm [shape: f32[2,4,16], index: 3, kind: output, shape index: {}]  }
   0x1   :  { %10 = vsyncpa [#allocation3 + $0x1], 0  ;;  %s444_s12 = smov 0   ;;  %s446_s13 = smov 0  }
   0x2   :  { %s448_s14 = smov 0   ;;  %s450_s15 = smov 0  }
   0x3 LB: > { %s465_s16 = sadd.s32 4294967295, %s419_s15   ;;  %s298_s17 = sadd.s32 4294967294, %s419_s15   ;;  %s419_s15 = sphi %s450_s15, %s549_s15   ;;  %s415_s14 = sphi %s448_s14, %s548_s14   ;;  %s411_s13 = sphi %s446_s13, %s547_s13   ;;  %s407_s12 = sphi %s444_s12, %s546_s12  }
   0x4   : > { %s469_s18 = sadd.s32 1, %s419_s15   ;;  %s91_s19 = sadd.s32 1, %s415_s14 }
   0x5   : > { %s88_s20 = ssub.s32 %s419_s15, %s469_s18  ;;  %p101_p0 = scmp.ne.s32.totalorder %s415_s14, %s411_s13 }
   0x6   : > { %p89_p1 = scmp.eq.s32.totalorder %s88_s20, 0  ;;  %p102_p2 = scmp.eq.s32.totalorder %s465_s16, 1 }
   0x7   : > { %p107_p3 = scmp.ne.s32.totalorder %s411_s13, %s407_s12  ;;  %p108_p4 = scmp.eq.s32.totalorder %s298_s17, 1 }
   0x8   : > { %s480_s21 = scalar_select %p89_p1, %s415_s14, %s91_s19  }
   0x9   : > { %p482_p5 = por %p102_p2, %p101_p0  ;;  %p486_p6 = por %p108_p4, %p107_p3 }
   0xa   : > { %p301_p7 = scmp.ge.s32.totalorder %s419_s15, 1  ;;  %p139_p8 = scmp.lt.s32.totalorder %s419_s15, 3 }
   0xc   : > { %p140_p9 = pnand %p301_p7, %p139_p8 }
   0xd   : > { %p162_p10 = scmp.lt.s32.totalorder (!%p140_p9), %s465_s16, 1  ;;  %s422_s8 = smov (!%p140_p9), 0.0  }
   0xe   : > { %143 = sbr.rel (%p140_p9) target bundleno = 586 (0x24a), region = 32  ;;  %s305_s27 = sshll.u32 (!%p140_p9), %s465_s16, 6 }
  0x13   : > { %s163_s24 = scalar_select %p162_p10, %s465_s16, 1  ;;  %vm167_vm0 = vcmask 125952   ;;  %vm175_vm1 = vcmask 3072   ;;  %v421_v21 = vmov 0   ;;  %v205_v25 = vld [vmem:[%s541_s1] sm:$0xf] }
  0x14   : > { %355 = vset.pattern.permute.xlu0 %v421_v21  ;;  %356 = vset.pattern.permute.xlu1 %v421_v21  ;;  %v208_v29 = vld [vmem:[%s542_s2] sm:$0xf] }
  0x15   : > { %s303_s25 = sshll.u32 %s163_s24, 2 }
  0x16   : > { %s165_s28 = scalar_lea.vmem %s540_s0, %s303_s25  ;;  %s159_s25 = sand.u32 1, %s411_s13  }
  0x17   : > { %v166_v0 = vld [vmem:[%s165_s28] sm:$0xf]  ;;  %s302_s26 = sshll.u32 %s159_s25, 2 }
  0x18   : > { %v168_v1 = vsel %vm167_vm0, %v166_v0, 0.0  ;;  %v171_v2 = vmul.f32 %v166_v0, %v166_v0  ;;  %s161_s28 = scalar_lea.vmem [#allocation2], %s302_s26 }
  0x19   : > { %169 = vadd.xlane.f32.xlu0 %v168_v1 }
  0x1a   : > { %v172_v3 = vsel %vm167_vm0, %v171_v2, 0.0 }
  0x1d   : > { %173 = vadd.xlane.f32.xlu0 %v172_v3 }
  0xa2   : > { %v170_v4 = vpop.xlane.xlu0 %169 }
  0xa3   : > { %v176_v5 = vsel %vm175_vm1, %v170_v4, 0.0 }
  0xa4   : > { %177 = vadd.xlane.f32.xlu1 %v176_v5 }
  0xa6   : > { %v174_v6 = vpop.xlane.xlu0 %173 }
  0xa7   : > { %v186_v7 = vsel %vm175_vm1, %v174_v6, 0.0 }
  0xa8   : > { %187 = vadd.xlane.f32.xlu1 %v186_v7 }
 0x12d   : > { %v178_v8 = vpop.xlane.xlu1 %177 }
 0x12e   : > { %v179_v9 = vrot.slane %v178_v8, 4 }
 0x130   : > { %v180_v10 = vadd.f32 %v179_v9, %v178_v8 }
 0x131   : > { %v188_v11 = vpop.xlane.xlu1 %187 }
 0x132   : > { %v181_v12 = vrot.slane %v180_v10, 2  ;;  %v189_v13 = vrot.slane %v188_v11, 4 }
 0x134   : > { %v190_v14 = vadd.f32 %v189_v13, %v188_v11  ;;  %v182_v15 = vadd.f32 %v181_v12, %v180_v10 }
 0x136   : > { %v191_v16 = vrot.slane %v190_v14, 2  ;;  %v183_v17 = vrot.slane %v182_v15, 1 }
 0x138   : > { %v184_v18 = vadd.f32 %v183_v17, %v182_v15  ;;  %v192_v19 = vadd.f32 %v191_v16, %v190_v14 }
 0x13a   : > { %308 = vpush %v184_v18  ;;  %v193_v20 = vrot.slane %v192_v19, 1 }
 0x13c   : > { %v194_v22 = vadd.f32 %v193_v20, %v192_v19 }
 0x13e   : > { %310 = vpush %v194_v22 }
 0x16b   : > { %s309_s29 = spop %308 }
 0x16c   : > { %s196_s30 = smul.f32 0.015625, %s309_s29  ;;  %s239_s29 = sshll.u32 %s161_s28, 4  ;;  %s240_s29 = int_to_ptr.vmem [resolvable:$true] %s239_s29 }
 0x16e   : > { %s198_s4 = smul.f32 %s196_s30, %s196_s30  ;;  %v209_v28 = vstv %s196_s30 }
 0x16f   : > { %s311_s5 = spop %310 }
 0x170   : > { %s197_s6 = smul.f32 0.015625, %s311_s5  ;;  %s237_s5 = scalar_lea.hbm %s543_s3, %s305_s27 }
 0x172   : > { %s199_s7 = ssub.f32 %s197_s6, %s198_s4  ;;  %s226_s6 = scalar_lea.sflag [#allocation3], %s159_s25 }
 0x174   : > { %s200_s9 = smax.f32 %s422_s8, %s199_s7  ;;  %s359_s7 = scalar_lea.vmem %s240_s29, 64 }
 0x175   : > { %s201_s10 = sadd.f32 1e-05, %s200_s9  ;;  %p360_p11 = scmp.ne.s32.totalorder %s240_s29, %s359_s7 }
 0x176   : > { %s423_s8 = smov [#allocation2]  }
 0x177   : > { %v202_v23 = vstv %s201_s10  ;;  %p361_p12 = pnand %p360_p11, %p482_p5  ;;  %s363_s16 = sshll.u32 %s423_s8, 4  ;;  %s364_s16 = int_to_ptr.vmem [resolvable:$false] %s363_s16 }
 0x178   : > { %357 = vrsqrt.f32 %v202_v23  ;;  %s365_s9 = scalar_lea.vmem %s364_s16, 128  ;;  %p366_p0 = scmp.lt.s32.totalorder %s240_s29, %s364_s16 }
 0x179   : > { %p362_p13 = pneg %p361_p12  ;;  %p367_p1 = scmp.lt.s32.totalorder %s365_s9, %s359_s7 }
 0x17b   : > { %p368_p2 = por %p367_p1, %p366_p0 }
 0x17d   : > { %p369_p3 = pnand %p368_p2, %p362_p13 }
 0x185   : > { %v358_v24 = vpop.eup %357 }
 0x186   : > { %312 = vpush %v358_v24 }
 0x1b7   : > { %s313_s19 = spop %312 }
 0x1b8   : > { %v206_v26 = vstv %s313_s19 }
 0x1b9   : > { %v207_v27 = vmul.f32 %v206_v26, %v205_v25 }
 0x1bb   : > { %v210_v30 = vmul.f32 %v209_v28, %v207_v27  ;;  %214 = vperm.xlu0 %355, %v207_v27  }
 0x1bd   : > { %v211_v31 = vsub.f32 %v208_v29, %v210_v30 }
 0x1bf   : > { %220 = vperm.xlu1 %356, %v211_v31  }
 0x236   : > { %v215_v32 = vpop.permute.xlu0 %214 }
 0x237   : > { %v217_v33 = vmul.f32 %v215_v32, %v166_v0 }
 0x23a   : > { %v221_v34 = vpop.permute.xlu1 %220 }
 0x23b   : > { %v223_v35 = vadd.f32 %v221_v34, %v217_v33 }
 0x23d   : > { %224 = vst.msk [vmem:[%s161_s28] sm:$0xf] %vm167_vm0, %v223_v35 }
 0x23e   : > { %372 = shalt.err (!%p369_p3)
}
 0x23f   : > { %s373_s10 = scalar_lea.hbm %s237_s5, 64  ;;  %s377_s19 = scalar_lea.hbm %s543_s3, 128 }
 0x240   : > { %p374_p4 = scmp.ne.s32.totalorder %s237_s5, %s373_s10  ;;  %p378_p9 = scmp.lt.s32.totalorder %s237_s5, %s543_s3 }
 0x241   : > { %p379_p10 = scmp.lt.s32.totalorder %s377_s19, %s373_s10 }
 0x242   : > { %p375_p7 = pnand %p374_p4, %p482_p5 }
 0x243   : > { %p380_p11 = por %p379_p10, %p378_p9 }
 0x244   : > { %p376_p8 = pneg %p375_p7 }
 0x246   : > { %p381_p12 = pnand %p380_p11, %p376_p8 }
 0x248   : > { %384 = shalt.err (!%p381_p12)
}
 0x249   : > { %314 = dma.vmem_to_hbm [thread:$0]  (%p482_p5), %s240_s29, 64, %s237_s5, %s226_s6  }
 0x24a PF: > { %p320_p13 = scmp.ge.s32.totalorder %s419_s15, 2  ;;  %s251_s25 = sand.u32 1, %s407_s12  }
 0x24b   : > { %s252_s26 = scalar_lea.sflag [#allocation3], %s251_s25 }
 0x24c   : > { %p317_p0 = pnand %p320_p13, %p486_p6 }
 0x24e   : > { %p318_p1 = pneg %p317_p0 }
 0x250   : > { %402 = dma.done.wait (%p318_p1), %s252_s26, 64  }
 0x251   : > { %404 = vsyncadd (%p318_p1), %s252_s26, 4294967232  ;;  %p13_p2 = scmp.ge.s32.totalorder %s469_s18, 4   ;;  %s546_s12 = smov %s411_s13 }
 0x252   : > { %s547_s13 = smov %s415_s14  ;;  %s548_s14 = smov %s480_s21 }
 0x253   : > { %s549_s15 = smov %s469_s18  ;;  %15 = sbr.rel (!%p13_p2) target bundleno = 3 (0x3), region = 67 }
 0x258   :  { %257 = vsyncpa [#allocation3], 1 }
 0x259   :  { %259 = vsyncpa [#allocation3 + $0x1], 1 }

</bundles_post_ra>
